<compile_context>
chip_gen: v5e
topology: v5e:2x2
jax: 0.10.0
libtpu: 0.0.40
codegen_flags: <defaults>
</compile_context>

<pallas_src>
import jax
import jax.numpy as jnp
from jax import lax
from jax.experimental import pallas as pl
from jax.experimental.pallas import tpu as pltpu

LANE = 128  # all persistent weight output axes padded to one full vreg lane width


# ----------------------------- fused Pallas kernel ---------------------------

def selfgnn_fused_kernel(adj_ref, x_ref, w1_ref, b1_ref, w2_ref, b2_ref,
                         wp_ref, bp_ref, rep_ref, loss_ref):
    """Entire SelfGNN forward (both views, student + implicit teacher) fused.

    adj_ref : (2N, 2N)  block-diagonal normalized adjacency [A^1 0; 0 A^2]
    x_ref   : (2N, F)   node features, view1 rows then view2 rows (unpadded K)
    w1_ref  : (F, 128)   b1_ref : (1, 128)
    w2_ref  : (128, 128) b2_ref : (1, 128)
    wp_ref  : (128, 128) bp_ref : (1, 128)
    rep_ref : (2N, 128)  output reps (lane-dense; real REP cols are [:REP])
    loss_ref: (1, 1) SMEM scalar symmetric BYOL loss
    """
    adj = adj_ref[...]                                    # (2N, 2N)
    x = x_ref[...]                                        # (2N, F)

    # GCN layer 1: h = A^ (X W1) + b1       (single 2-D matmuls, M = 2N)
    xw = jnp.dot(x, w1_ref[...], preferred_element_type=jnp.float32)
    h = jnp.dot(adj, xw, preferred_element_type=jnp.float32) + b1_ref[...]

    # GCN layer 2: rep = A^ (h W2) + b2
    hw = jnp.dot(h, w2_ref[...], preferred_element_type=jnp.float32)
    rep = jnp.dot(adj, hw, preferred_element_type=jnp.float32) + b2_ref[...]

    # encoder_norm='none' and prj_head_norm='no' -> v_student = v_rep.
    rep_ref[...] = rep                                    # unmasked 128-lane store

    # Student predictor: Linear -> identity Normalize -> ReLU -> Dropout(p=0).
    pred = jnp.maximum(
        jnp.dot(rep, wp_ref[...], preferred_element_type=jnp.float32)
        + bp_ref[...], 0.0)

    # Teacher encoder == deepcopy of student at first forward (no_grad),
    # so v_teacher == rep.  (Padding lanes of rep/pred are exactly zero and
    # contribute nothing to the cosine reductions below.)
    n = rep.shape[0] // 2
    pred1, pred2 = pred[:n], pred[n:]
    teach1, teach2 = rep[:n], rep[n:]

    # Symmetric BYOL cosine loss:
    #   loss_fn(a, b) = 2 - 2 * <a/|a|, b/|b|>
    #   loss = mean_n( loss_fn(v1_pred, v2_teacher) + loss_fn(v2_pred, v1_teacher) )
    eps = jnp.float32(1e-24)  # ~ (F.normalize eps 1e-12)^2; keeps zero rows finite
    def cos(a, b):
        ab = jnp.sum(a * b, axis=-1, keepdims=True)       # (N, 1)
        aa = jnp.sum(a * a, axis=-1, keepdims=True)
        bb = jnp.sum(b * b, axis=-1, keepdims=True)
        return ab * lax.rsqrt(aa + eps) * lax.rsqrt(bb + eps)

    l = (2.0 - 2.0 * cos(pred1, teach2)) + (2.0 - 2.0 * cos(pred2, teach1))
    # (loss1 + loss2).mean() in torch divides the per-node SUM once by N.
    loss_ref[0, 0] = jnp.sum(l) * jnp.float32(1.0 / n)


# ------------------------------ wrappers --------------------------------------

def pad_params(params):
    """One-time, at init: store params in lane-dense (128) padded form."""
    w1, b1, w2, b2, wp, bp = params
    def pad_cols(a):
        return jnp.pad(a, [(0, 0), (0, LANE - a.shape[1])])
    def pad_both(a):
        return jnp.pad(a, [(0, LANE - a.shape[0]), (0, LANE - a.shape[1])])
    return (pad_cols(w1), pad_cols(b1),          # (F,128), (1,128)
            pad_both(w2), pad_cols(b2),          # (128,128), (1,128)
            pad_both(wp), pad_cols(bp))          # (128,128), (1,128)


def block_diag_adj(adj1, adj2):
    """One-time, at setup: block-diagonal [A^1 0; 0 A^2] of shape (2N, 2N)."""
    n1, n2 = adj1.shape[0], adj2.shape[0]
    top = jnp.concatenate([adj1, jnp.zeros((n1, n2), adj1.dtype)], axis=1)
    bot = jnp.concatenate([jnp.zeros((n2, n1), adj2.dtype), adj2], axis=1)
    return jnp.concatenate([top, bot], axis=0)


@jax.jit
def selfgnn_forward(padded_params, x1, x2, adj_block):
    """Fused SelfGNN forward.

    Returns (rep_pad, loss_arr):
      rep_pad  : (2N, 128) lane-dense reps; rows [:N] are view1, [N:] view2,
                 real columns are [:REP]  (canonical padded output -- no
                 per-call slicing in the step path).
      loss_arr : (1, 1) scalar loss.
    """
    w1p, b1p, w2p, b2p, wpp, bpp = padded_params
    x = jnp.concatenate([x1, x2], axis=0)                 # (2N, F)
    two_n = x.shape[0]

    vmem = pl.BlockSpec(memory_space=pltpu.MemorySpace.VMEM)
    smem = pl.BlockSpec(memory_space=pltpu.MemorySpace.SMEM)
    rep_pad, loss_arr = pl.pallas_call(
        selfgnn_fused_kernel,
        out_shape=(jax.ShapeDtypeStruct((two_n, LANE), jnp.float32),
                   jax.ShapeDtypeStruct((1, 1), jnp.float32)),
        in_specs=[vmem] * 8,
        out_specs=(vmem, smem),
    )(adj_block, x, w1p, b1p, w2p, b2p, wpp, bpp)
    return rep_pad, loss_arr


def build_norm_adj(edge_index, edge_weight, n):
    """Dense A^ = D^-1/2 (A + I) D^-1/2 matching PyG GCNConv gcn_norm defaults.

    edge_index[0] = source, edge_index[1] = target; aggregation at the target,
    so A_dense[dst, src] = edge_weight.  Self loops get weight 1.
    (Setup glue, done once in plain JAX.)
    """
    src, dst = edge_index[0], edge_index[1]
    a = jnp.zeros((n, n), jnp.float32).at[dst, src].add(edge_weight)
    a = a + jnp.eye(n, dtype=jnp.float32)
    deg = jnp.sum(a, axis=1)
    dinv = jnp.where(deg > 0, 1.0 / jnp.sqrt(deg), 0.0)
    return dinv[:, None] * a * dinv[None, :]


# ------------------------- pure-JAX reference (check) --------------------------

def selfgnn_reference(params, x1, x2, adj1, adj2):
    w1, b1, w2, b2, wp, bp = params

    def encode(adj, x):
        h = adj @ (x @ w1) + b1
        return adj @ (h @ w2) + b2

    def predict(r):
        return jnp.maximum(r @ wp + bp, 0.0)

    def loss_fn(a, b):
        an = a / jnp.maximum(jnp.linalg.norm(a, axis=-1, keepdims=True), 1e-12)
        bn = b / jnp.maximum(jnp.linalg.norm(b, axis=-1, keepdims=True), 1e-12)
        return 2.0 - 2.0 * jnp.sum(an * bn, axis=-1)

    r1, r2 = encode(adj1, x1), encode(adj2, x2)
    p1, p2 = predict(r1), predict(r2)
    loss = jnp.mean(loss_fn(p1, r2) + loss_fn(p2, r1))
    return r1, r2, loss


# ------------------------------- main ------------------------------------------

if __name__ == "__main__":
    N = 16        # number of graph nodes per view
    IN_DIM = 32   # input feature dim
    HID = 32      # layers = [IN_DIM, HID, REP]
    REP = 32

    key = jax.random.PRNGKey(0)
    keys = jax.random.split(key, 10)

    def glorot(k, fan_in, fan_out):
        lim = (6.0 / (fan_in + fan_out)) ** 0.5
        return jax.random.uniform(k, (fan_in, fan_out), jnp.float32, -lim, lim)

    w1 = glorot(keys[0], IN_DIM, HID)
    b1 = jax.random.normal(keys[1], (1, HID), jnp.float32) * 0.01
    w2 = glorot(keys[2], HID, REP)
    b2 = jax.random.normal(keys[3], (1, REP), jnp.float32) * 0.01
    wp = glorot(keys[4], REP, REP)
    bp = jax.random.normal(keys[5], (1, REP), jnp.float32) * 0.01
    params = (w1, b1, w2, b2, wp, bp)

    # One-time init-side work (outside the per-step path): pad weights to the
    # lane-dense form the kernel consumes.
    padded_params = jax.tree_util.tree_map(
        jax.block_until_ready, pad_params(params))

    # Two augmented views: random node features + two ring-style graphs.
    x1 = jax.random.normal(keys[6], (N, IN_DIM), jnp.float32)
    x2 = jax.random.normal(keys[7], (N, IN_DIM), jnp.float32)

    nodes = jnp.arange(N)
    # View 1: undirected ring (i <-> i+1).
    src1 = jnp.concatenate([nodes, (nodes + 1) % N])
    dst1 = jnp.concatenate([(nodes + 1) % N, nodes])
    edge_index_v1 = jnp.stack([src1, dst1])
    edge_weight_v1 = jax.random.uniform(keys[8], (2 * N,), jnp.float32, 0.5, 1.5)
    # View 2: undirected "skip-2" ring (i <-> i+2).
    src2 = jnp.concatenate([nodes, (nodes + 2) % N])
    dst2 = jnp.concatenate([(nodes + 2) % N, nodes])
    edge_index_v2 = jnp.stack([src2, dst2])
    edge_weight_v2 = jax.random.uniform(keys[9], (2 * N,), jnp.float32, 0.5, 1.5)

    # One-time setup glue: dense normalized adjacencies and their block-diag.
    adj1 = build_norm_adj(edge_index_v1, edge_weight_v1, N)
    adj2 = build_norm_adj(edge_index_v2, edge_weight_v2, N)
    adj_block = jax.block_until_ready(block_diag_adj(adj1, adj2))

    # Per-step path: one fused kernel, no padding/slicing glue.
    rep_pad, loss_arr = selfgnn_forward(padded_params, x1, x2, adj_block)
    jax.block_until_ready((rep_pad, loss_arr))

    assert rep_pad.shape == (2 * N, LANE)
    loss = loss_arr[0, 0]
    assert bool(jnp.isfinite(loss))

    # Slice the real REP columns exactly once, where they are consumed
    # (the correctness check), not in the per-step path.
    v1_rep = rep_pad[:N, :REP]
    v2_rep = rep_pad[N:, :REP]

    # Correctness check against a pure-JAX reference of the same config.
    r1_ref, r2_ref, loss_ref = selfgnn_reference(params, x1, x2, adj1, adj2)
    assert bool(jnp.allclose(v1_rep, r1_ref, rtol=1e-4, atol=1e-4))
    assert bool(jnp.allclose(v2_rep, r2_ref, rtol=1e-4, atol=1e-4))
    assert bool(jnp.allclose(loss, loss_ref, rtol=1e-4, atol=1e-4))
    # Padding lanes must be exactly zero (so the padded slab is safe to consume).
    assert bool(jnp.all(rep_pad[:, REP:] == 0.0))

    # TODO(synk): training-mode dropout (p>0), BatchNorm/LayerNorm Normalize
    # variants, and the EMA teacher update are not part of this forward config.
    print("KERNEL_OK")
</pallas_src>

<mosaic_0001>
module attributes {stable_mosaic.version = 11 : i64} {
  func.func @selfgnn_fused_kernel(%arg0: memref<32x32xf32, #tpu.memory_space<vmem>>, %arg1: memref<32x32xf32, #tpu.memory_space<vmem>>, %arg2: memref<32x128xf32, #tpu.memory_space<vmem>>, %arg3: memref<1x128xf32, #tpu.memory_space<vmem>>, %arg4: memref<128x128xf32, #tpu.memory_space<vmem>>, %arg5: memref<1x128xf32, #tpu.memory_space<vmem>>, %arg6: memref<128x128xf32, #tpu.memory_space<vmem>>, %arg7: memref<1x128xf32, #tpu.memory_space<vmem>>, %arg8: memref<32x128xf32, #tpu.memory_space<vmem>>, %arg9: memref<1x1xf32, #tpu.memory_space<smem>>) attributes {dimension_semantics = [], scalar_prefetch = 0 : i64, scratch_operands = 0 : i64, tpu.core_type = #tpu.core_type<tc>} {
    %c0 = arith.constant 0 : index
    %c0_0 = arith.constant 0 : index
    %0 = vector.load %arg0[%c0, %c0_0] : memref<32x32xf32, #tpu.memory_space<vmem>>, vector<32x32xf32>
    %c0_1 = arith.constant 0 : index
    %c0_2 = arith.constant 0 : index
    %1 = vector.load %arg1[%c0_1, %c0_2] : memref<32x32xf32, #tpu.memory_space<vmem>>, vector<32x32xf32>
    %c0_3 = arith.constant 0 : index
    %c0_4 = arith.constant 0 : index
    %2 = vector.load %arg2[%c0_3, %c0_4] : memref<32x128xf32, #tpu.memory_space<vmem>>, vector<32x128xf32>
    %cst = arith.constant dense<0.000000e+00> : vector<32x128xf32>
    %3 = tpu.matmul %1, %2, %cst {dimension_numbers = #tpu.dot_dimension_numbers<[1], [0], [0], [1], [0, 0, 1, 1], [], []>} : vector<32x32xf32>, vector<32x128xf32>, vector<32x128xf32> -> vector<32x128xf32>
    %cst_5 = arith.constant dense<0.000000e+00> : vector<32x128xf32>
    %4 = tpu.matmul %0, %3, %cst_5 {dimension_numbers = #tpu.dot_dimension_numbers<[1], [0], [0], [1], [0, 0, 1, 1], [], []>} : vector<32x32xf32>, vector<32x128xf32>, vector<32x128xf32> -> vector<32x128xf32>
    %c0_6 = arith.constant 0 : index
    %c0_7 = arith.constant 0 : index
    %5 = vector.load %arg3[%c0_6, %c0_7] : memref<1x128xf32, #tpu.memory_space<vmem>>, vector<1x128xf32>
    %6 = vector.broadcast %5 : vector<1x128xf32> to vector<32x128xf32>
    %7 = arith.addf %4, %6 : vector<32x128xf32>
    %c0_8 = arith.constant 0 : index
    %c0_9 = arith.constant 0 : index
    %8 = vector.load %arg4[%c0_8, %c0_9] : memref<128x128xf32, #tpu.memory_space<vmem>>, vector<128x128xf32>
    %cst_10 = arith.constant dense<0.000000e+00> : vector<32x128xf32>
    %9 = tpu.matmul %7, %8, %cst_10 {dimension_numbers = #tpu.dot_dimension_numbers<[1], [0], [0], [1], [0, 0, 1, 1], [], []>} : vector<32x128xf32>, vector<128x128xf32>, vector<32x128xf32> -> vector<32x128xf32>
    %cst_11 = arith.constant dense<0.000000e+00> : vector<32x128xf32>
    %10 = tpu.matmul %0, %9, %cst_11 {dimension_numbers = #tpu.dot_dimension_numbers<[1], [0], [0], [1], [0, 0, 1, 1], [], []>} : vector<32x32xf32>, vector<32x128xf32>, vector<32x128xf32> -> vector<32x128xf32>
    %c0_12 = arith.constant 0 : index
    %c0_13 = arith.constant 0 : index
    %11 = vector.load %arg5[%c0_12, %c0_13] : memref<1x128xf32, #tpu.memory_space<vmem>>, vector<1x128xf32>
    %12 = vector.broadcast %11 : vector<1x128xf32> to vector<32x128xf32>
    %13 = arith.addf %10, %12 : vector<32x128xf32>
    %c0_14 = arith.constant 0 : index
    %c0_15 = arith.constant 0 : index
    %14 = vector.load %arg8[%c0_14, %c0_15] : memref<32x128xf32, #tpu.memory_space<vmem>>, vector<32x128xf32>
    tpu.vector_store %arg8[%c0_14, %c0_15], %13 {strides = array<i32>} : memref<32x128xf32, #tpu.memory_space<vmem>>, vector<32x128xf32>,
    %c0_16 = arith.constant 0 : index
    %c0_17 = arith.constant 0 : index
    %15 = vector.load %arg6[%c0_16, %c0_17] : memref<128x128xf32, #tpu.memory_space<vmem>>, vector<128x128xf32>
    %cst_18 = arith.constant dense<0.000000e+00> : vector<32x128xf32>
    %16 = tpu.matmul %13, %15, %cst_18 {dimension_numbers = #tpu.dot_dimension_numbers<[1], [0], [0], [1], [0, 0, 1, 1], [], []>} : vector<32x128xf32>, vector<128x128xf32>, vector<32x128xf32> -> vector<32x128xf32>
    %c0_19 = arith.constant 0 : index
    %c0_20 = arith.constant 0 : index
    %17 = vector.load %arg7[%c0_19, %c0_20] : memref<1x128xf32, #tpu.memory_space<vmem>>, vector<1x128xf32>
    %18 = vector.broadcast %17 : vector<1x128xf32> to vector<32x128xf32>
    %19 = arith.addf %16, %18 : vector<32x128xf32>
    %cst_21 = arith.constant 0.000000e+00 : f32
    %20 = vector.broadcast %cst_21 : f32 to vector<32x128xf32>
    %21 = arith.maximumf %19, %20 : vector<32x128xf32>
    %22 = vector.extract_strided_slice %21 {offsets = [0, 0], sizes = [16, 128], strides = [1, 1]} : vector<32x128xf32> to vector<16x128xf32>
    %23 = vector.extract_strided_slice %21 {offsets = [16, 0], sizes = [16, 128], strides = [1, 1]} : vector<32x128xf32> to vector<16x128xf32>
    %24 = vector.extract_strided_slice %13 {offsets = [0, 0], sizes = [16, 128], strides = [1, 1]} : vector<32x128xf32> to vector<16x128xf32>
    %25 = vector.extract_strided_slice %13 {offsets = [16, 0], sizes = [16, 128], strides = [1, 1]} : vector<32x128xf32> to vector<16x128xf32>
    %26 = arith.mulf %22, %25 : vector<16x128xf32>
    %cst_22 = arith.constant dense<0.000000e+00> : vector<16xf32>
    %27 = vector.multi_reduction <add>, %26, %cst_22 [1] : vector<16x128xf32> to vector<16xf32>
    %28 = vector.shape_cast %27 : vector<16xf32> to vector<16x1xf32>
    %29 = arith.mulf %22, %22 : vector<16x128xf32>
    %cst_23 = arith.constant dense<0.000000e+00> : vector<16xf32>
    %30 = vector.multi_reduction <add>, %29, %cst_23 [1] : vector<16x128xf32> to vector<16xf32>
    %31 = vector.shape_cast %30 : vector<16xf32> to vector<16x1xf32>
    %32 = arith.mulf %25, %25 : vector<16x128xf32>
    %cst_24 = arith.constant dense<0.000000e+00> : vector<16xf32>
    %33 = vector.multi_reduction <add>, %32, %cst_24 [1] : vector<16x128xf32> to vector<16xf32>
    %34 = vector.shape_cast %33 : vector<16xf32> to vector<16x1xf32>
    %cst_25 = arith.constant 1.000000e-24 : f32
    %35 = vector.broadcast %cst_25 : f32 to vector<16x1xf32>
    %36 = arith.addf %31, %35 : vector<16x1xf32>
    %37 = math.rsqrt %36 : vector<16x1xf32>
    %38 = arith.mulf %28, %37 : vector<16x1xf32>
    %cst_26 = arith.constant 1.000000e-24 : f32
    %39 = vector.broadcast %cst_26 : f32 to vector<16x1xf32>
    %40 = arith.addf %34, %39 : vector<16x1xf32>
    %41 = math.rsqrt %40 : vector<16x1xf32>
    %42 = arith.mulf %38, %41 : vector<16x1xf32>
    %cst_27 = arith.constant 2.000000e+00 : f32
    %43 = vector.broadcast %cst_27 : f32 to vector<16x1xf32>
    %44 = arith.mulf %43, %42 : vector<16x1xf32>
    %cst_28 = arith.constant 2.000000e+00 : f32
    %45 = vector.broadcast %cst_28 : f32 to vector<16x1xf32>
    %46 = arith.subf %45, %44 : vector<16x1xf32>
    %47 = arith.mulf %23, %24 : vector<16x128xf32>
    %cst_29 = arith.constant dense<0.000000e+00> : vector<16xf32>
    %48 = vector.multi_reduction <add>, %47, %cst_29 [1] : vector<16x128xf32> to vector<16xf32>
    %49 = vector.shape_cast %48 : vector<16xf32> to vector<16x1xf32>
    %50 = arith.mulf %23, %23 : vector<16x128xf32>
    %cst_30 = arith.constant dense<0.000000e+00> : vector<16xf32>
    %51 = vector.multi_reduction <add>, %50, %cst_30 [1] : vector<16x128xf32> to vector<16xf32>
    %52 = vector.shape_cast %51 : vector<16xf32> to vector<16x1xf32>
    %53 = arith.mulf %24, %24 : vector<16x128xf32>
    %cst_31 = arith.constant dense<0.000000e+00> : vector<16xf32>
    %54 = vector.multi_reduction <add>, %53, %cst_31 [1] : vector<16x128xf32> to vector<16xf32>
    %55 = vector.shape_cast %54 : vector<16xf32> to vector<16x1xf32>
    %cst_32 = arith.constant 1.000000e-24 : f32
    %56 = vector.broadcast %cst_32 : f32 to vector<16x1xf32>
    %57 = arith.addf %52, %56 : vector<16x1xf32>
    %58 = math.rsqrt %57 : vector<16x1xf32>
    %59 = arith.mulf %49, %58 : vector<16x1xf32>
    %cst_33 = arith.constant 1.000000e-24 : f32
    %60 = vector.broadcast %cst_33 : f32 to vector<16x1xf32>
    %61 = arith.addf %55, %60 : vector<16x1xf32>
    %62 = math.rsqrt %61 : vector<16x1xf32>
    %63 = arith.mulf %59, %62 : vector<16x1xf32>
    %cst_34 = arith.constant 2.000000e+00 : f32
    %64 = vector.broadcast %cst_34 : f32 to vector<16x1xf32>
    %65 = arith.mulf %64, %63 : vector<16x1xf32>
    %cst_35 = arith.constant 2.000000e+00 : f32
    %66 = vector.broadcast %cst_35 : f32 to vector<16x1xf32>
    %67 = arith.subf %66, %65 : vector<16x1xf32>
    %68 = arith.addf %46, %67 : vector<16x1xf32>
    %69 = vector.shape_cast %68 : vector<16x1xf32> to vector<1x16x1xf32>
    %cst_36 = arith.constant dense<0.000000e+00> : vector<1xf32>
    %70 = vector.multi_reduction <add>, %69, %cst_36 [1, 2] : vector<1x16x1xf32> to vector<1xf32>
    %71 = vector.shape_cast %70 : vector<1xf32> to vector<1x1x1xf32>
    %72 = vector.extract %71[0, 0, 0] : f32 from vector<1x1x1xf32>
    %cst_37 = arith.constant 6.250000e-02 : f32
    %73 = arith.mulf %72, %cst_37 : f32
    %c0_38 = arith.constant 0 : index
    %c0_39 = arith.constant 0 : index
    %74 = memref.load %arg9[%c0_38, %c0_39] : memref<1x1xf32, #tpu.memory_space<smem>>
    memref.store %73, %arg9[%c0_38, %c0_39] : memref<1x1xf32, #tpu.memory_space<smem>>
    return
  }
}

</mosaic_0001>

<bundles_post_ra>
// kernel: selfgnn_forward.1
= control target key start
LH: loop header
LB: loop body
LE: loop exit
PB: predicated region body
PF: predicated region fallthrough
CT: control target
= control target key end

     0   :  { %15 = vsyncpa [#allocation3], 0  ;;  %s914_s0 = inlined_call_operand.vmem [shape: f32[32,32], index: 0, kind: input, shape index: {}]   ;;  %s915_s1 = inlined_call_operand.vmem [shape: f32[32,32], index: 1, kind: input, shape index: {}]   ;;  %s916_s2 = inlined_call_operand.vmem [shape: f32[32,128], index: 2, kind: input, shape index: {}]   ;;  %s917_s3 = inlined_call_operand.hbm [shape: f32[1,128], index: 3, kind: input, shape index: {}]   ;;  %s918_s4 = inlined_call_operand.hbm [shape: f32[128,128], index: 4, kind: input, shape index: {}]   ;;  %s919_s5 = inlined_call_operand.vmem [shape: f32[1,128], index: 5, kind: input, shape index: {}]   ;;  %s920_s6 = inlined_call_operand.hbm [shape: f32[128,128], index: 6, kind: input, shape index: {}]   ;;  %s921_s7 = inlined_call_operand.vmem [shape: f32[1,128], index: 7, kind: input, shape index: {}]   ;;  %s922_s8 = inlined_call_operand.hbm [shape: f32[32,128], index: 8, kind: output, shape index: {0}]   ;;  %s923_s9 = inlined_call_operand.hbm [shape: f32[1,1], index: 9, kind: output, shape index: {1}]  }
   0x1   :  { %16 = vsyncpa [#allocation7], 0 }
   0x2   :  { %17 = vsyncpa [#allocation4], 0  ;;  %s40_s11 = sshll.u32 %s918_s4, 4  ;;  %s41_s11 = int_to_ptr.hbm [resolvable:$true] %s40_s11 }
   0x3   :  { %18 = vsyncpa [#allocation5], 0  ;;  %s677_s12 = smov [#allocation6]   ;;  %s30_s16 = sshll.u32 %s917_s3, 4  ;;  %s31_s16 = int_to_ptr.hbm [resolvable:$true] %s30_s16 }
   0x4   :  { %s42_s13 = sshll.u32 %s677_s12, 4  ;;  %s678_s17 = smov 128   ;;  %s43_s13 = int_to_ptr.vmem [resolvable:$true] %s42_s13 }
   0x5   :  { %s679_s18 = smov 8   ;;  %s680_s19 = smov [#allocation2]  }
   0x6   :  { %48 = dma.hbm_to_vmem [thread:$0]  %s41_s11, 2048, %s43_s13, [#allocation7], %s678_s17, %s678_s17, %s679_s18  }
   0x7   :  { %s32_s20 = sshll.u32 %s680_s19, 4  ;;  %s55_s22 = sshll.u32 %s920_s6, 4  ;;  %s33_s20 = int_to_ptr.vmem [resolvable:$true] %s32_s20  ;;  %s56_s22 = int_to_ptr.hbm [resolvable:$true] %s55_s22 }
   0x8   :  { %35 = dma.hbm_to_vmem [thread:$0]  %s31_s16, 16, %s33_s20, [#allocation3]  }
   0x9   :  { %s681_s23 = smov [#allocation8]  }
   0xa   :  { %s57_s24 = sshll.u32 %s681_s23, 4  ;;  %s58_s24 = int_to_ptr.vmem [resolvable:$true] %s57_s24 }
   0xb   :  { %63 = dma.hbm_to_vmem [thread:$0]  %s56_s22, 2048, %s58_s24, [#allocation7], %s678_s17, %s678_s17, %s679_s18  }
   0xc   :  { %669 = dma.done.wait [#allocation3], 16  }
   0xd   :  { %670 = vsyncadd [#allocation3], 4294967280 }
   0xe   :  { %671 = dma.done.wait [#allocation7], 4096  }
   0xf   :  { %672 = vsyncadd [#allocation7], 4294963200  ;;  %v89_v0 = vld [vmem:[%s916_s2 + $0x18] sm:$0xff]  ;;  %v88_v1 = vld [vmem:[%s916_s2 + $0x10] sm:$0xff]  ;;  %vm90_vm0 = vcmask 261120   ;;  %s476_s6 = sshll.u32 %s922_s8, 4  ;;  %s477_s6 = int_to_ptr.hbm [resolvable:$true] %s476_s6 }
  0x10   :  { %115 = vmatpush.msra.mxu0 %v89_v0  ;;  %v87_v2 = vld [vmem:[%s916_s2 + $0x8] sm:$0xff]  ;;  %v86_v3 = vld [vmem:[%s916_s2] sm:$0xff]  ;;  %v84_v6 = vld [vmem:[%s915_s1 + $0x10] sm:$0xff]  ;;  %s682_s27 = smov [#allocation9]   ;;  %s488_s8 = sshll.u32 %s923_s9, 4  ;;  %s489_s8 = int_to_ptr.hbm [resolvable:$true] %s488_s8 }
  0x11   :  { %v82_v4 = vld [vmem:[%s915_s1] sm:$0xff]  ;;  %v83_v5 = vld [vmem:[%s915_s1 + $0x8] sm:$0xff]  ;;  %v85_v7 = vld [vmem:[%s915_s1 + $0x18] sm:$0xff]  ;;  %s474_s28 = sshll.u32 %s682_s27, 4  ;;  %s683_s12 = smov [#allocation10]   ;;  %s475_s28 = int_to_ptr.vmem [resolvable:$true] %s474_s28 }
  0x12   :  { %116 = vmatpush.msra.mxu0 %v88_v1  ;;  %v192_v12 = vld [vmem:[#allocation6 + $0x78] sm:$0xff]  ;;  %v191_v13 = vld [vmem:[#allocation6 + $0x70] sm:$0xff]  ;;  %v190_v14 = vld [vmem:[#allocation6 + $0x68] sm:$0xff] }
  0x13   :  { %193 = vmatpush.msra.mxu2 %v192_v12  ;;  %v189_v15 = vld [vmem:[#allocation6 + $0x60] sm:$0xff]  ;;  %v188_v17 = vld [vmem:[#allocation6 + $0x58] sm:$0xff]  ;;  %v187_v18 = vld [vmem:[#allocation6 + $0x50] sm:$0xff] }
  0x14   :  { %117 = vmatpush.msra.mxu0 %v87_v2  ;;  %v780_v16 = vld [vmem:[%s914_s0] sm:$0xff]  ;;  %v186_v19 = vld [vmem:[#allocation6 + $0x48] sm:$0xff]  ;;  %v183_v23 = vld [vmem:[#allocation6 + $0x30] sm:$0xff] }
  0x15   :  { %194 = vmatpush.msra.mxu2 %v191_v13  ;;  %v185_v20 = vld [vmem:[#allocation6 + $0x40] sm:$0xff]  ;;  %v184_v22 = vld [vmem:[#allocation6 + $0x38] sm:$0xff]  ;;  %v182_v24 = vld [vmem:[#allocation6 + $0x28] sm:$0xff] }
  0x16   :  { %118 = vmatpush.msra.mxu0 %v86_v3  ;;  %v787_v21 = vld [vmem:[%s914_s0 + $0x8] sm:$0xff]  ;;  %v794_v26 = vld [vmem:[%s914_s0 + $0x10] sm:$0xff]  ;;  %v180_v27 = vld [vmem:[#allocation6 + $0x18] sm:$0xff] }
  0x17   :  { %505 = vmatmul.msk.f32.vlgmr.msra.gmra.mxu0 %vm90_vm0, %v82_v4  ;;  %195 = vmatpush.msra.mxu2 %v190_v14  ;;  %v181_v25 = vld [vmem:[#allocation6 + $0x20] sm:$0xff]  ;;  %v179_v28 = vld [vmem:[#allocation6 + $0x10] sm:$0xff]  ;;  %v178_v30 = vld [vmem:[#allocation6 + $0x8] sm:$0xff] }
  0x18   :  { %v801_v29 = vld [vmem:[%s914_s0 + $0x18] sm:$0xff]  ;;  %v177_v31 = vld [vmem:[#allocation6] sm:$0xff]  ;;  %v542_v32 = vld [vmem:[#allocation2] ss:$0 sm:$0xff] }
  0x19   :  { %196 = vmatpush.msra.mxu2 %v189_v15  ;;  %v274_v45 = vld [vmem:[#allocation8 + $0x78] sm:$0xff]  ;;  %v273_v46 = vld [vmem:[#allocation8 + $0x70] sm:$0xff]  ;;  %v272_v47 = vld [vmem:[#allocation8 + $0x68] sm:$0xff] }
  0x1a   :  { %279 = vmatpush.msrb.mxu0 %v274_v45  ;;  %v271_v48 = vld [vmem:[#allocation8 + $0x60] sm:$0xff]  ;;  %v270_v49 = vld [vmem:[#allocation8 + $0x58] sm:$0xff]  ;;  %v269_v50 = vld [vmem:[#allocation8 + $0x50] sm:$0xff] }
  0x1b   :  { %197 = vmatpush.msra.mxu2 %v188_v17  ;;  %v268_v51 = vld [vmem:[#allocation8 + $0x48] sm:$0xff]  ;;  %v267_v52 = vld [vmem:[#allocation8 + $0x40] sm:$0xff]  ;;  %v266_v53 = vld [vmem:[#allocation8 + $0x38] sm:$0xff] }
  0x1c   :  { %280 = vmatpush.msrb.mxu0 %v273_v46  ;;  %v265_v54 = vld [vmem:[#allocation8 + $0x30] sm:$0xff]  ;;  %v264_v55 = vld [vmem:[#allocation8 + $0x28] sm:$0xff]  ;;  %v263_v56 = vld [vmem:[#allocation8 + $0x20] sm:$0xff] }
  0x1d   :  { %198 = vmatpush.msra.mxu2 %v187_v18  ;;  %v262_v57 = vld [vmem:[#allocation8 + $0x18] sm:$0xff]  ;;  %v261_v58 = vld [vmem:[#allocation8 + $0x10] sm:$0xff]  ;;  %v260_v59 = vld [vmem:[#allocation8 + $0x8] sm:$0xff] }
  0x1e   :  { %281 = vmatpush.msrb.mxu0 %v272_v47  ;;  %v259_v60 = vld [vmem:[#allocation8] sm:$0xff]  ;;  %v543_v61 = vld [vmem:[%s919_s5] ss:$0 sm:$0xff] }
  0x1f   :  { %506 = vmatmul.msk.f32.gmra.mxu0 %vm90_vm0, %v83_v5  ;;  %199 = vmatpush.msra.mxu2 %v186_v19 }
  0x20   :  { %282 = vmatpush.msrb.mxu0 %v271_v48 }
  0x21   :  { %200 = vmatpush.msra.mxu2 %v185_v20 }
  0x22   :  { %283 = vmatpush.msrb.mxu0 %v270_v49 }
  0x23   :  { %201 = vmatpush.msra.mxu2 %v184_v22 }
  0x24   :  { %284 = vmatpush.msrb.mxu0 %v269_v50 }
  0x25   :  { %202 = vmatpush.msra.mxu2 %v183_v23 }
  0x26   :  { %285 = vmatpush.msrb.mxu0 %v268_v51 }
  0x27   :  { %507 = vmatmul.msk.f32.gmra.mxu0 %vm90_vm0, %v84_v6  ;;  %203 = vmatpush.msra.mxu2 %v182_v24 }
  0x28   :  { %286 = vmatpush.msrb.mxu0 %v267_v52 }
  0x29   :  { %204 = vmatpush.msra.mxu2 %v181_v25 }
  0x2a   :  { %287 = vmatpush.msrb.mxu0 %v266_v53 }
  0x2b   :  { %205 = vmatpush.msra.mxu2 %v180_v27 }
  0x2c   :  { %288 = vmatpush.msrb.mxu0 %v265_v54 }
  0x2d   :  { %206 = vmatpush.msra.mxu2 %v179_v28 }
  0x2e   :  { %289 = vmatpush.msrb.mxu0 %v264_v55 }
  0x2f   :  { %508 = vmatmul.msk.f32.gmra.mxu0 %vm90_vm0, %v85_v7  ;;  %207 = vmatpush.msra.mxu2 %v178_v30 }
  0x30   :  { %290 = vmatpush.msrb.mxu0 %v263_v56 }
  0x31   :  { %208 = vmatpush.msra.mxu2 %v177_v31 }
  0x32   :  { %291 = vmatpush.msrb.mxu0 %v262_v57 }
  0x34   :  { %292 = vmatpush.msrb.mxu0 %v261_v58 }
  0x36   :  { %293 = vmatpush.msrb.mxu0 %v260_v59 }
  0x38   :  { %294 = vmatpush.msrb.mxu0 %v259_v60 }
  0x94   :  { %v120_v8 = vpop.f32.mrf.mxu0 }
  0x9c   :  { %v123_v9 = vpop.f32.mrf.mxu0 }
  0xa4   :  { %v126_v10 = vpop.f32.mrf.mxu0 }
  0xac   :  { %v129_v11 = vpop.f32.mrf.mxu0 }
  0xad   :  { %160 = vmatpush.msra.mxu1 %v129_v11 }
  0xaf   :  { %161 = vmatpush.msra.mxu1 %v126_v10 }
  0xb1   :  { %162 = vmatpush.msra.mxu1 %v123_v9 }
  0xb3   :  { %163 = vmatpush.msra.mxu1 %v120_v8  ;;  %v544_v8 = vld [vmem:[%s921_s7] ss:$0 sm:$0xff] }
  0xb4   :  { %509 = vmatmul.msk.f32.vlgmr.msra.gmra.mxu1 %vm90_vm0, %v780_v16 }
  0xb5   :  { %517 = vmatpush.msrb.mxu1 %v274_v45 }
  0xb7   :  { %518 = vmatpush.msrb.mxu1 %v273_v46 }
  0xb9   :  { %519 = vmatpush.msrb.mxu1 %v272_v47 }
  0xbb   :  { %520 = vmatpush.msrb.mxu1 %v271_v48 }
  0xbc   :  { %510 = vmatmul.msk.f32.gmra.mxu1 %vm90_vm0, %v787_v21 }
  0xbd   :  { %521 = vmatpush.msrb.mxu1 %v270_v49 }
  0xbf   :  { %522 = vmatpush.msrb.mxu1 %v269_v50 }
  0xc1   :  { %523 = vmatpush.msrb.mxu1 %v268_v51 }
  0xc3   :  { %524 = vmatpush.msrb.mxu1 %v267_v52 }
  0xc4   :  { %511 = vmatmul.msk.f32.gmra.mxu1 %vm90_vm0, %v794_v26 }
  0xc5   :  { %525 = vmatpush.msrb.mxu1 %v266_v53 }
  0xc7   :  { %526 = vmatpush.msrb.mxu1 %v265_v54 }
  0xc9   :  { %527 = vmatpush.msrb.mxu1 %v264_v55 }
  0xcb   :  { %528 = vmatpush.msrb.mxu1 %v263_v56 }
  0xcc   :  { %512 = vmatmul.msk.f32.gmra.mxu1 %vm90_vm0, %v801_v29 }
  0xcd   :  { %529 = vmatpush.msrb.mxu1 %v262_v57 }
  0xcf   :  { %530 = vmatpush.msrb.mxu1 %v261_v58 }
  0xd1   :  { %531 = vmatpush.msrb.mxu1 %v260_v59 }
  0xd3   :  { %532 = vmatpush.msrb.mxu1 %v259_v60 }
 0x131   :  { %v165_v33 = vpop.f32.mrf.mxu1 }
 0x132   :  { %v166_v34 = vadd.f32 %v542_v32, %v165_v33 }
 0x134   :  { %209 = vmatmul.f32.vlgmr.msra.gmra.mxu2 %v166_v34 }
 0x139   :  { %v168_v35 = vpop.f32.mrf.mxu1 }
 0x13a   :  { %v169_v36 = vadd.f32 %v542_v32, %v168_v35 }
 0x13c   :  { %212 = vmatmul.f32.gmra.mxu2 %v169_v36 }
 0x141   :  { %v171_v37 = vpop.f32.mrf.mxu1 }
 0x142   :  { %v172_v38 = vadd.f32 %v542_v32, %v171_v37 }
 0x144   :  { %215 = vmatmul.f32.gmra.mxu2 %v172_v38 }
 0x149   :  { %v174_v39 = vpop.f32.mrf.mxu1 }
 0x14a   :  { %v175_v40 = vadd.f32 %v542_v32, %v174_v39 }
 0x14c   :  { %218 = vmatmul.f32.gmra.mxu2 %v175_v40 }
 0x1b7   :  { %v210_v41 = vpop.f32.mrf.mxu2 }
 0x1bf   :  { %v213_v42 = vpop.f32.mrf.mxu2 }
 0x1c7   :  { %v216_v43 = vpop.f32.mrf.mxu2 }
 0x1cf   :  { %v219_v44 = vpop.f32.mrf.mxu2 }
 0x1d0   :  { %238 = vmatpush.msra.mxu3 %v219_v44 }
 0x1d2   :  { %239 = vmatpush.msra.mxu3 %v216_v43 }
 0x1d4   :  { %240 = vmatpush.msra.mxu3 %v213_v42 }
 0x1d6   :  { %241 = vmatpush.msra.mxu3 %v210_v41 }
 0x1d7   :  { %513 = vmatmul.msk.f32.vlgmr.msra.gmra.mxu3 %vm90_vm0, %v780_v16 }
 0x1df   :  { %514 = vmatmul.msk.f32.gmra.mxu3 %vm90_vm0, %v787_v21 }
 0x1e7   :  { %515 = vmatmul.msk.f32.gmra.mxu3 %vm90_vm0, %v794_v26 }
 0x1ef   :  { %516 = vmatmul.msk.f32.gmra.mxu3 %vm90_vm0, %v801_v29 }
 0x25a   :  { %v243_v62 = vpop.f32.mrf.mxu3 }
 0x25b   :  { %v244_v63 = vadd.f32 %v543_v61, %v243_v62 }
 0x25d   :  { %255 = vst [vmem:[#allocation9] sm:$0xff] %v244_v63  ;;  %295 = vmatmul.f32.vlgmr.msrb.gmra.mxu0 %v244_v63  ;;  %v394_v22 = vmul.f32 %v244_v63, %v244_v63 }
 0x262   :  { %v246_v0 = vpop.f32.mrf.mxu3 }
 0x263   :  { %v247_v1 = vadd.f32 %v543_v61, %v246_v0 }
 0x265   :  { %256 = vst [vmem:[#allocation9 + $0x8] sm:$0xff] %v247_v1  ;;  %298 = vmatmul.f32.gmra.mxu0 %v247_v1  ;;  %v395_v29 = vmul.f32 %v247_v1, %v247_v1 }
 0x26a   :  { %v249_v2 = vpop.f32.mrf.mxu3 }
 0x26b   :  { %v250_v3 = vadd.f32 %v543_v61, %v249_v2 }
 0x26d   :  { %257 = vst [vmem:[#allocation9 + $0x10] sm:$0xff] %v250_v3  ;;  %301 = vmatmul.f32.vlgmr.msrb.gmra.mxu1 %v250_v3  ;;  %v324_v4 = vmul.f32 %v250_v3, %v250_v3 }
 0x26f   :  { %326 = vadd.xlane.f32.xlu2 %v324_v4 }
 0x272   :  { %v252_v5 = vpop.f32.mrf.mxu3 }
 0x273   :  { %v253_v6 = vadd.f32 %v543_v61, %v252_v5 }
 0x275   :  { %258 = vst [vmem:[#allocation9 + $0x18] sm:$0xff] %v253_v6  ;;  %304 = vmatmul.f32.gmra.mxu1 %v253_v6  ;;  %v325_v7 = vmul.f32 %v253_v6, %v253_v6 }
 0x276   :  { %482 = dma.vmem_to_hbm [thread:$0]  %s475_s28, 512, %s477_s6, [#allocation4], %s678_s17, %s678_s17, %s679_s18  }
 0x277   :  { %328 = vadd.xlane.f32.xlu2 %v325_v7 }
 0x2da   :  { %v296_v9 = vpop.f32.mrf.mxu0 }
 0x2db   :  { %v297_v10 = vadd.f32 %v544_v8, %v296_v9 }
 0x2dd   :  { %v308_v11 = vmax.f32 %v297_v10, 0.0 }
 0x2df   :  { %v318_v12 = vmul.f32 %v308_v11, %v308_v11  ;;  %v312_v13 = vmul.f32 %v308_v11, %v250_v3 }
 0x2e1   :  { %320 = vadd.xlane.f32.xlu0 %v318_v12  ;;  %314 = vadd.xlane.f32.xlu2 %v312_v13 }
 0x2e2   :  { %v299_v14 = vpop.f32.mrf.mxu0  ;;  %v327_v32 = vpop.xlane.xlu2 %326 }
 0x2e3   :  { %v300_v15 = vadd.f32 %v544_v8, %v299_v14  ;;  %v821_v37 = vadd.f32 1e-24, %v327_v32 }
 0x2e5   :  { %v309_v16 = vmax.f32 %v300_v15, 0.0  ;;  %vm362_vm13 = vweird.f32 %v821_v37 }
 0x2e7   :  { %v319_v17 = vmul.f32 %v309_v16, %v309_v16  ;;  %v313_v27 = vmul.f32 %v309_v16, %v253_v6 }
 0x2e9   :  { %322 = vadd.xlane.f32.xlu0 %v319_v17 }
 0x2ea   :  { %v302_v18 = vpop.f32.mrf.mxu1  ;;  %v329_v36 = vpop.xlane.xlu2 %328 }
 0x2eb   :  { %v303_v19 = vadd.f32 %v544_v8, %v302_v18  ;;  %v824_v38 = vadd.f32 1e-24, %v329_v36 }
 0x2ed   :  { %v310_v20 = vmax.f32 %v303_v19, 0.0 }
 0x2ef   :  { %v388_v21 = vmul.f32 %v310_v20, %v310_v20  ;;  %v382_v30 = vmul.f32 %v310_v20, %v244_v63 }
 0x2f1   :  { %390 = vadd.xlane.f32.xlu1 %v388_v21  ;;  %396 = vadd.xlane.f32.xlu0 %v394_v22 }
 0x2f2   :  { %v305_v23 = vpop.f32.mrf.mxu1 }
 0x2f3   :  { %v306_v24 = vadd.f32 %v544_v8, %v305_v23 }
 0x2f5   :  { %v311_v25 = vmax.f32 %v306_v24, 0.0 }
 0x2f7   :  { %v389_v26 = vmul.f32 %v311_v25, %v311_v25  ;;  %v383_v28 = vmul.f32 %v311_v25, %v247_v1 }
 0x2f9   :  { %392 = vadd.xlane.f32.xlu1 %v389_v26  ;;  %316 = vadd.xlane.f32.xlu0 %v313_v27 }
 0x2fa   :  { %386 = vadd.xlane.f32.xlu2 %v383_v28 }
 0x301   :  { %398 = vadd.xlane.f32.xlu1 %v395_v29 }
 0x309   :  { %384 = vadd.xlane.f32.xlu1 %v382_v30 }
 0x354   :  { %v321_v31 = vpop.xlane.xlu0 %320  ;;  %v315_v30 = vpop.xlane.xlu2 %314 }
 0x355   :  { %v330_v33 = vadd.f32 1e-24, %v321_v31 }
 0x357   :  { %545 = vrsqrt.f32 %v330_v33  ;;  %vm338_vm3 = vweird.f32 %v330_v33 }
 0x35c   :  { %v323_v34 = vpop.xlane.xlu0 %322 }
 0x35d   :  { %v819_v35 = vadd.f32 1e-24, %v323_v34  ;;  %v826_v39 = vpop.eup %545 }
 0x35e   :  { %v333_v45 = vmul.f32 %v826_v39, %v330_v33  ;;  %vm339_vm1 = vweird.f32 %v826_v39 }
 0x35f   :  { %547 = vrsqrt.f32 %v819_v35  ;;  %vm868_vm4 = vmor %vm338_vm3, %vm339_vm1  ;;  %vm348_vm7 = vweird.f32 %v819_v35  ;;  %vm372_vm1 = vweird.f32 %v824_v38 }
 0x360   :  { %549 = vrsqrt.f32 %v821_v37  ;;  %v334_v48 = vmul.f32 %v826_v39, %v333_v45 }
 0x361   :  { %551 = vrsqrt.f32 %v824_v38 }
 0x362   :  { %v335_v58 = vmul.f32 0.5, %v334_v48 }
 0x364   :  { %v391_v40 = vpop.xlane.xlu1 %390  ;;  %v397_v41 = vpop.xlane.xlu0 %396  ;;  %v336_v2 = vsub.f32 1.5, %v335_v58 }
 0x365   :  { %v400_v42 = vadd.f32 1e-24, %v391_v40  ;;  %v829_v43 = vadd.f32 1e-24, %v397_v41  ;;  %v832_v44 = vpop.eup %547 }
 0x366   :  { %v836_v46 = vpop.eup %549  ;;  %v343_v47 = vmul.f32 %v832_v44, %v819_v35  ;;  %v337_v12 = vmul.f32 %v826_v39, %v336_v2  ;;  %vm349_vm5 = vweird.f32 %v832_v44 }
 0x367   :  { %553 = vrsqrt.f32 %v400_v42  ;;  %v841_v49 = vpop.eup %551  ;;  %v357_v52 = vmul.f32 %v836_v46, %v821_v37  ;;  %vm408_vm6 = vweird.f32 %v400_v42  ;;  %vm363_vm10 = vweird.f32 %v836_v46  ;;  %vm881_vm11 = vmor %vm348_vm7, %vm349_vm5 }
 0x368   :  { %555 = vrsqrt.f32 %v829_v43  ;;  %v344_v55 = vmul.f32 %v832_v44, %v343_v47  ;;  %v367_v57 = vmul.f32 %v841_v49, %v824_v38  ;;  %v341_v21 = vsel %vm868_vm4, %v826_v39, %v337_v12 }
 0x369   :  { %v358_v61 = vmul.f32 %v836_v46, %v357_v52  ;;  %vm432_vm12 = vweird.f32 %v829_v43  ;;  %v352_v33 = vmul.f32 %v341_v21, %v315_v30  ;;  %vm373_vm14 = vweird.f32 %v841_v49 }
 0x36a   :  { %v345_v63 = vmul.f32 0.5, %v344_v55  ;;  %v368_v1 = vmul.f32 %v841_v49, %v367_v57  ;;  %vm374_vm3 = vmor %vm372_vm1, %vm373_vm14 }
 0x36b   :  { %v359_v7 = vmul.f32 0.5, %v358_v61 }
 0x36c   :  { %v393_v50 = vpop.xlane.xlu1 %392  ;;  %v346_v10 = vsub.f32 1.5, %v345_v63  ;;  %v369_v11 = vmul.f32 0.5, %v368_v1  ;;  %v317_v35 = vpop.xlane.xlu0 %316 }
 0x36d   :  { %v554_v51 = vpop.eup %553  ;;  %v845_v53 = vadd.f32 1e-24, %v393_v50  ;;  %v360_v16 = vsub.f32 1.5, %v359_v7 }
 0x36e   :  { %v847_v54 = vpop.eup %555  ;;  %v403_v56 = vmul.f32 %v554_v51, %v400_v42  ;;  %vm409_vm2 = vweird.f32 %v554_v51  ;;  %v347_v19 = vmul.f32 %v832_v44, %v346_v10  ;;  %v370_v20 = vsub.f32 1.5, %v369_v11 }
 0x36f   :  { %v427_v59 = vmul.f32 %v847_v54, %v829_v43  ;;  %557 = vrsqrt.f32 %v845_v53  ;;  %vm410_vm8 = vmor %vm408_vm6, %vm409_vm2  ;;  %vm433_vm9 = vweird.f32 %v847_v54  ;;  %v361_v29 = vmul.f32 %v836_v46, %v360_v16 }
 0x370   :  { %v404_v60 = vmul.f32 %v554_v51, %v403_v56  ;;  %v351_v31 = vsel %vm881_vm11, %v832_v44, %v347_v19  ;;  %v371_v34 = vmul.f32 %v841_v49, %v370_v20  ;;  %vm434_vm15 = vmor %vm432_vm12, %vm433_vm9  ;;  %vm418_vm4 = vweird.f32 %v845_v53 }
 0x371   :  { %v428_v62 = vmul.f32 %v847_v54, %v427_v59  ;;  %vm364_vm2 = vmor %vm362_vm13, %vm363_vm10  ;;  %v353_v37 = vmul.f32 %v351_v31, %v317_v35  ;;  %vm454_vm9 = vcmask 7168  }
 0x372   :  { %v405_v0 = vmul.f32 0.5, %v404_v60  ;;  %v365_v42 = vsel %vm364_vm2, %v836_v46, %v361_v29  ;;  %v375_v45 = vsel %vm374_vm3, %v841_v49, %v371_v34 }
 0x373   :  { %v429_v3 = vmul.f32 0.5, %v428_v62  ;;  %v376_v44 = vmul.f32 %v365_v42, %v352_v33  ;;  %v377_v38 = vmul.f32 %v375_v45, %v353_v37 }
 0x374   :  { %v399_v4 = vpop.xlane.xlu1 %398  ;;  %v406_v5 = vsub.f32 1.5, %v405_v0 }
 0x375   :  { %v858_v6 = vpop.eup %557  ;;  %v860_v8 = vadd.f32 1e-24, %v399_v4  ;;  %v430_v13 = vsub.f32 1.5, %v429_v3 }
 0x376   :  { %v413_v9 = vmul.f32 %v858_v6, %v845_v53  ;;  %v407_v15 = vmul.f32 %v554_v51, %v406_v5  ;;  %vm419_vm0 = vweird.f32 %v858_v6  ;;  %v379_v53 = vmul.f32 2.0, %v377_v38 }
 0x377   :  { %559 = vrsqrt.f32 %v860_v8  ;;  %v431_v25 = vmul.f32 %v847_v54, %v430_v13  ;;  %vm420_vm5 = vmor %vm418_vm4, %vm419_vm0  ;;  %vm442_vm7 = vweird.f32 %v860_v8 }
 0x378   :  { %v414_v14 = vmul.f32 %v858_v6, %v413_v9  ;;  %v411_v23 = vsel %vm410_vm8, %v554_v51, %v407_v15  ;;  %v387_v51 = vpop.xlane.xlu2 %386  ;;  %v381_v49 = vsub.f32 2.0, %v379_v53 }
 0x379   :  { %v435_v40 = vsel %vm434_vm15, %v847_v54, %v431_v25  ;;  %v378_v54 = vmul.f32 2.0, %v376_v44 }
 0x37a   :  { %v415_v18 = vmul.f32 0.5, %v414_v14 }
 0x37b   :  { %v380_v58 = vsub.f32 2.0, %v378_v54 }
 0x37c   :  { %v416_v22 = vsub.f32 1.5, %v415_v18  ;;  %v385_v24 = vpop.xlane.xlu1 %384 }
 0x37d   :  { %v560_v26 = vpop.eup %559  ;;  %v422_v28 = vmul.f32 %v411_v23, %v385_v24 }
 0x37e   :  { %v437_v32 = vmul.f32 %v560_v26, %v860_v8  ;;  %v417_v36 = vmul.f32 %v858_v6, %v416_v22  ;;  %vm443_vm6 = vweird.f32 %v560_v26 }
 0x37f   :  { %v446_v41 = vmul.f32 %v435_v40, %v422_v28  ;;  %vm444_vm8 = vmor %vm442_vm7, %vm443_vm6 }
 0x380   :  { %v438_v39 = vmul.f32 %v560_v26, %v437_v32  ;;  %v421_v47 = vsel %vm420_vm5, %v858_v6, %v417_v36 }
 0x381   :  { %v448_v50 = vmul.f32 2.0, %v446_v41  ;;  %v423_v46 = vmul.f32 %v421_v47, %v387_v51 }
 0x382   :  { %v439_v43 = vmul.f32 0.5, %v438_v39 }
 0x383   :  { %v450_v56 = vsub.f32 2.0, %v448_v50 }
 0x384   :  { %v440_v48 = vsub.f32 1.5, %v439_v43 }
 0x385   :  { %v452_v61 = vadd.f32 %v450_v56, %v380_v58 }
 0x386   :  { %v441_v52 = vmul.f32 %v560_v26, %v440_v48 }
 0x387   :  { %v455_v63 = vsel %vm454_vm9, %v452_v61, 0.0 }
 0x388   :  { %v445_v55 = vsel %vm444_vm8, %v560_v26, %v441_v52 }
 0x389   :  { %v447_v57 = vmul.f32 %v445_v55, %v423_v46 }
 0x38b   :  { %v449_v59 = vmul.f32 2.0, %v447_v57 }
 0x38d   :  { %v451_v60 = vsub.f32 2.0, %v449_v59 }
 0x38f   :  { %v453_v62 = vadd.f32 %v451_v60, %v381_v49 }
 0x391   :  { %v456_v0 = vsel %vm454_vm9, %v453_v62, 0.0 }
 0x392   :  { %v457_v1 = vadd.f32 %v456_v0, %v455_v63 }
 0x394   :  { %458 = vadd.xlane.f32.xlu0 %v457_v1 }
 0x407   :  { %v459_v2 = vpop.xlane.xlu0 %458 }
 0x408   :  { %v460_v3 = vrot.slane %v459_v2, 4 }
 0x40a   :  { %v461_v4 = vadd.f32 %v460_v3, %v459_v2 }
 0x40c   :  { %v462_v5 = vrot.slane %v461_v4, 2 }
 0x40e   :  { %v463_v6 = vadd.f32 %v462_v5, %v461_v4 }
 0x410   :  { %v464_v7 = vrot.slane %v463_v6, 1 }
 0x412   :  { %v465_v8 = vadd.f32 %v464_v7, %v463_v6 }
 0x414   :  { %533 = vpush %v465_v8 }
 0x445   :  { %s534_s10 = spop %533 }
 0x446   :  { %s467_s11 = smul.f32 0.0625, %s534_s10 }
 0x448   :  { %469 = sst [smem:[#allocation10]] %s467_s11 }
 0x449   :  { %491 = dma.smem_to_hbm %s683_s12, 16, %s489_s8, [#allocation5]  }
 0x44a   :  { %673 = dma.done.wait [#allocation4], 512  }
 0x44b   :  { %674 = vsyncadd [#allocation4], 4294966784 }
 0x44c   :  { %675 = dma.done.wait [#allocation5], 16  }
 0x44d   :  { %676 = vsyncadd [#allocation5], 4294967280 }
 0x44e   :  { %500 = sfence }
 0x44f   :  { %501 = vsyncpa [#allocation3], 1 }
 0x450   :  { %502 = vsyncpa [#allocation7], 1 }
 0x451   :  { %503 = vsyncpa [#allocation4], 1 }
 0x452   :  { %504 = vsyncpa [#allocation5], 1 }

</bundles_post_ra>
